<compile_context>
chip_gen: v5e
topology: v5e:2x2
jax: 0.10.0
libtpu: 0.0.40
codegen_flags: <defaults>
</compile_context>

<pallas_src>
import functools

import jax
import jax.numpy as jnp
import numpy as np
from jax.experimental import pallas as pl
from jax.experimental.pallas import tpu as pltpu


_VMEM_LIMIT_BYTES = 48 * 1024 * 1024    # <= 64 MiB (v7x physical), plenty on v5e/v6e
_VMEM_BUDGET_BYTES = 40 * 1024 * 1024   # headroom under the limit for the 2-D path


def _round_up(v, m):
    return ((v + m - 1) // m) * m


def _pick_tile(dim_p, max_tile, align):
    """Largest multiple-of-`align` divisor of `dim_p` that is <= max_tile.

    `dim_p` is already a multiple of `align`, so `align` is always a valid
    fallback (worst case: more grid steps, never more padding).
    """
    if dim_p <= max_tile:
        return dim_p
    t = (max_tile // align) * align
    while t > align:
        if dim_p % t == 0:
            return t
        t -= align
    return align


def _linear_bias_kernel_2d(x_ref, w_ref, b_ref, o_ref):
    # x_ref: (tm, IN_p); w_ref: (IN_p, tn) canonical [k, n]; b_ref: (1, tn).
    # Whole contraction in one MXU pass; bias add in f32; single downcast.
    acc = jnp.dot(x_ref[...], w_ref[...], preferred_element_type=jnp.float32)
    o_ref[...] = (acc + b_ref[...].astype(jnp.float32)).astype(o_ref.dtype)


def _linear_bias_kernel_ktiled(x_ref, w_ref, b_ref, o_ref, acc_ref):
    # Fallback for very large IN: K-tiled accumulation in an f32 VMEM scratch.
    # Bias is folded into the accumulator init (no zero-fill + epilogue add).
    k = pl.program_id(2)

    @pl.when(k == 0)
    def _():
        acc_ref[...] = jnp.broadcast_to(
            b_ref[...].astype(jnp.float32), acc_ref.shape)

    acc_ref[...] += jnp.dot(x_ref[...], w_ref[...],
                            preferred_element_type=jnp.float32)

    @pl.when(k == pl.num_programs(2) - 1)
    def _():
        o_ref[...] = acc_ref[...].astype(o_ref.dtype)


@functools.partial(
    jax.jit,
    static_argnames=("out_features", "out_dtype", "max_tm", "max_tn", "max_tk"))
def _split_bias_linear_padded(x, w_kn, b_row, *, out_features, out_dtype,
                              max_tm=512, max_tn=512, max_tk=512):
    """Hot path.  x: (B, IN) unpadded; w_kn: (IN_p, OUT_p) prepared weight;
    b_row: (1, OUT_p) f32 bias row.  Returns (B, out_features) in out_dtype."""
    B, IN = x.shape
    IN_p, OUT_p = w_kn.shape
    assert IN <= IN_p and out_features <= OUT_p

    # Pad activations only to hardware minima (8 sublanes on B; IN up to the
    # 128-aligned contraction dim of the cached weight).  Zero padding along K
    # contributes nothing to the dot product; padded M/N rows/cols are sliced
    # off at the end.
    B_p = _round_up(max(B, 1), 8)
    if (B_p, IN_p) != (B, IN):
        x = jnp.pad(x, ((0, B_p - B), (0, IN_p - IN)))

    elt_in = x.dtype.itemsize
    elt_w = w_kn.dtype.itemsize
    elt_out = np.dtype(out_dtype).itemsize

    tm = _pick_tile(B_p, max_tm, 8)
    tn = _pick_tile(OUT_p, max_tn, 128)

    # v7x has 2 TensorCores per chip: if the (M, N) grid collapses to a single
    # tile, split N so the "parallel" axes have work for both cores.
    if (B_p // tm) * (OUT_p // tn) == 1 and OUT_p > 128:
        tn = _pick_tile(OUT_p, max(OUT_p // 2, 128), 128)

    # Prefer the 2-D grid (no accumulator RMW, no pl.when, no per-K-step
    # overhead) whenever the double-buffered tiles fit comfortably in VMEM.
    vmem_need_2d = (2 * (tm * IN_p * elt_in + IN_p * tn * elt_w + tn * 4)
                    + 2 * tm * tn * elt_out)
    use_2d = vmem_need_2d <= _VMEM_BUDGET_BYTES

    cost = pl.CostEstimate(
        flops=2 * B_p * IN_p * OUT_p,
        transcendentals=0,
        bytes_accessed=(B_p * IN_p * elt_in + IN_p * OUT_p * elt_w
                        + OUT_p * 4 + B_p * OUT_p * elt_out),
    )

    if use_2d:
        out_p = pl.pallas_call(
            _linear_bias_kernel_2d,
            out_shape=jax.ShapeDtypeStruct((B_p, OUT_p), out_dtype),
            grid_spec=pltpu.PrefetchScalarGridSpec(
                num_scalar_prefetch=0,
                grid=(B_p // tm, OUT_p // tn),
                in_specs=[
                    pl.BlockSpec((tm, IN_p), lambda i, j: (i, 0)),   # x tile
                    pl.BlockSpec((IN_p, tn), lambda i, j: (0, j)),   # weight [k, n]
                    pl.BlockSpec((1, tn), lambda i, j: (0, j)),      # bias row
                ],
                out_specs=pl.BlockSpec((tm, tn), lambda i, j: (i, j)),
            ),
            compiler_params=pltpu.CompilerParams(
                dimension_semantics=("parallel", "parallel"),
                vmem_limit_bytes=_VMEM_LIMIT_BYTES,
            ),
            cost_estimate=cost,
        )(x, w_kn, b_row)
    else:
        tk = _pick_tile(IN_p, max_tk, 128)
        out_p = pl.pallas_call(
            _linear_bias_kernel_ktiled,
            out_shape=jax.ShapeDtypeStruct((B_p, OUT_p), out_dtype),
            grid_spec=pltpu.PrefetchScalarGridSpec(
                num_scalar_prefetch=0,
                grid=(B_p // tm, OUT_p // tn, IN_p // tk),
                in_specs=[
                    pl.BlockSpec((tm, tk), lambda i, j, k: (i, k)),   # x tile
                    pl.BlockSpec((tk, tn), lambda i, j, k: (k, j)),   # weight [k, n]
                    pl.BlockSpec((1, tn), lambda i, j, k: (0, j)),    # bias row
                ],
                out_specs=pl.BlockSpec((tm, tn), lambda i, j, k: (i, j)),
                scratch_shapes=[pltpu.VMEM((tm, tn), jnp.float32)],
            ),
            compiler_params=pltpu.CompilerParams(
                dimension_semantics=("parallel", "parallel", "arbitrary"),
                vmem_limit_bytes=_VMEM_LIMIT_BYTES,
            ),
            cost_estimate=cost,
        )(x, w_kn, b_row)

    return out_p[:B, :out_features]


class SplitBiasLinear:
    """Pallas equivalent of SplitBias(nn.Linear(IN, OUT)).

    Weight/bias preparation (pad to 128-lane minima, transpose to the MXU
    canonical (IN_p, OUT_p) layout, optional bf16 cast) happens exactly once
    here — the static nn.Linear parameters are never re-padded or re-cast on
    the per-call path.
    """

    def __init__(self, weight, bias, compute_dtype=jnp.bfloat16):
        OUT, IN = weight.shape                      # PyTorch (OUT, IN) layout
        assert bias.shape == (OUT,)
        self.in_features = IN
        self.out_features = OUT
        self.compute_dtype = compute_dtype

        IN_p = _round_up(IN, 128)
        OUT_p = _round_up(OUT, 128)
        w = jnp.pad(weight, ((0, OUT_p - OUT), (0, IN_p - IN)))
        w_kn = jnp.transpose(w, (1, 0))             # (IN_p, OUT_p): canonical [k, n]
        if compute_dtype is not None:
            w_kn = w_kn.astype(compute_dtype)       # cast once, not per call
        self.w_kn = w_kn
        # Bias kept in f32: the epilogue add is done in f32 regardless.
        self.b_row = jnp.pad(bias.astype(jnp.float32),
                             (0, OUT_p - OUT)).reshape(1, OUT_p)

    def __call__(self, x):
        orig_dtype = x.dtype
        lead = x.shape[:-1]
        x2 = x.reshape(-1, self.in_features)
        if self.compute_dtype is not None:
            x2 = x2.astype(self.compute_dtype)      # cheap per-call activation cast
        y = _split_bias_linear_padded(
            x2, self.w_kn, self.b_row,
            out_features=self.out_features,
            out_dtype=np.dtype(orig_dtype))
        return y.reshape(*lead, self.out_features)


if __name__ == "__main__":
    key = jax.random.PRNGKey(0)
    k_x, k_w, k_b = jax.random.split(key, 3)

    # Small shapes consistent with SplitBias(nn.Linear(IN, OUT)).
    B, IN, OUT = 8, 32, 16
    x = jax.random.normal(k_x, (B, IN), dtype=jnp.float32)
    weight = jax.random.normal(k_w, (OUT, IN), dtype=jnp.float32) * 0.1
    bias = jax.random.normal(k_b, (OUT,), dtype=jnp.float32)

    # Pure-JAX reference of the SplitBias forward (bias-free linear + AddBias).
    ref = x @ weight.T + bias[None, :]

    # f32 compute path: exact check.
    mod_f32 = SplitBiasLinear(weight, bias, compute_dtype=None)
    out = jax.block_until_ready(mod_f32(x))
    assert out.shape == (B, OUT)
    assert jnp.allclose(out, ref, atol=1e-5, rtol=1e-5), "mismatch (f32 path)"

    # Default bf16 compute path (f32 accumulation + f32 bias add): looser tol.
    mod_bf16 = SplitBiasLinear(weight, bias)        # compute_dtype=bf16 default
    out_bf = jax.block_until_ready(mod_bf16(x))
    assert out_bf.dtype == x.dtype
    assert jnp.allclose(out_bf, ref, atol=5e-2, rtol=5e-2), "mismatch (bf16 path)"

    # Ragged, non-tile-aligned shape: padded only to (8, 128) minima now.
    B2, IN2, OUT2 = 300, 520, 200
    x2 = jax.random.normal(k_x, (B2, IN2), dtype=jnp.float32)
    w2 = jax.random.normal(k_w, (OUT2, IN2), dtype=jnp.float32) * 0.05
    b2 = jax.random.normal(k_b, (OUT2,), dtype=jnp.float32)
    out2 = jax.block_until_ready(SplitBiasLinear(w2, b2, compute_dtype=None)(x2))
    ref2 = x2 @ w2.T + b2[None, :]
    assert out2.shape == (B2, OUT2)
    assert jnp.allclose(out2, ref2, atol=1e-4, rtol=1e-4), "mismatch (ragged shape)"

    print("KERNEL_OK")
</pallas_src>

<mosaic_0001>
module attributes {stable_mosaic.version = 11 : i64} {
  func.func @_linear_bias_kernel_2d(%arg0: i32, %arg1: i32, %arg2: memref<8x128xf32, #tpu.memory_space<vmem>>, %arg3: memref<128x128xf32, #tpu.memory_space<vmem>>, %arg4: memref<1x128xf32, #tpu.memory_space<vmem>>, %arg5: memref<8x128xf32, #tpu.memory_space<vmem>>) attributes {dimension_semantics = [#tpu.dimension_semantics<parallel>, #tpu.dimension_semantics<parallel>], iteration_bounds = array<i64: 1, 1>, scalar_prefetch = 0 : i64, scratch_operands = 0 : i64, tpu.core_type = #tpu.core_type<tc>, window_params = [{transform_indices = @transform_0, window_bounds = array<i64: 8, 128>}, {transform_indices = @transform_1, window_bounds = array<i64: 128, 128>}, {transform_indices = @transform_2, window_bounds = array<i64: 1, 128>}, {transform_indices = @transform_3, window_bounds = array<i64: 8, 128>}]} {
    %c0 = arith.constant 0 : index
    %c0_0 = arith.constant 0 : index
    %0 = vector.load %arg2[%c0, %c0_0] : memref<8x128xf32, #tpu.memory_space<vmem>>, vector<8x128xf32>
    %c0_1 = arith.constant 0 : index
    %c0_2 = arith.constant 0 : index
    %1 = vector.load %arg3[%c0_1, %c0_2] : memref<128x128xf32, #tpu.memory_space<vmem>>, vector<128x128xf32>
    %cst = arith.constant dense<0.000000e+00> : vector<8x128xf32>
    %2 = tpu.matmul %0, %1, %cst {dimension_numbers = #tpu.dot_dimension_numbers<[1], [0], [0], [1], [0, 0, 1, 1], [], []>} : vector<8x128xf32>, vector<128x128xf32>, vector<8x128xf32> -> vector<8x128xf32>
    %c0_3 = arith.constant 0 : index
    %c0_4 = arith.constant 0 : index
    %3 = vector.load %arg4[%c0_3, %c0_4] : memref<1x128xf32, #tpu.memory_space<vmem>>, vector<1x128xf32>
    %4 = vector.broadcast %3 : vector<1x128xf32> to vector<8x128xf32>
    %5 = arith.addf %2, %4 : vector<8x128xf32>
    %c0_5 = arith.constant 0 : index
    %c0_6 = arith.constant 0 : index
    %6 = vector.load %arg5[%c0_5, %c0_6] : memref<8x128xf32, #tpu.memory_space<vmem>>, vector<8x128xf32>
    tpu.vector_store %arg5[%c0_5, %c0_6], %5 {strides = array<i32>} : memref<8x128xf32, #tpu.memory_space<vmem>>, vector<8x128xf32>,
    return
  }
  func.func @transform_0(%arg0: i32, %arg1: i32) -> (i32, i32) {
    %c0_i32 = arith.constant 0 : i32
    %c0_i32_0 = arith.constant 0 : i32
    return %arg0, %c0_i32 : i32, i32
  }
  func.func @transform_1(%arg0: i32, %arg1: i32) -> (i32, i32) {
    %c0_i32 = arith.constant 0 : i32
    %c0_i32_0 = arith.constant 0 : i32
    return %c0_i32, %arg1 : i32, i32
  }
  func.func @transform_2(%arg0: i32, %arg1: i32) -> (i32, i32) {
    %c0_i32 = arith.constant 0 : i32
    %c0_i32_0 = arith.constant 0 : i32
    return %c0_i32, %arg1 : i32, i32
  }
  func.func @transform_3(%arg0: i32, %arg1: i32) -> (i32, i32) {
    %c0_i32 = arith.constant 0 : i32
    return %arg0, %arg1 : i32, i32
  }
}

</mosaic_0001>

<bundles_post_ra>
// kernel: _split_bias_linear_padded.1
= control target key start
LH: loop header
LB: loop body
LE: loop exit
PB: predicated region body
PF: predicated region fallthrough
CT: control target
= control target key end

     0   :  { %8 = vsyncpa [#allocation3], 0  ;;  %s183_s0 = inlined_call_operand.vmem [shape: f32[8,128], index: 0, kind: input, shape index: {}]   ;;  %s184_s1 = inlined_call_operand.hbm [shape: f32[128,128], index: 1, kind: input, shape index: {}]   ;;  %s185_s2 = inlined_call_operand.vmem [shape: f32[1,128], index: 2, kind: input, shape index: {}]   ;;  %s186_s3 = inlined_call_operand.hbm [shape: f32[8,128], index: 3, kind: output, shape index: {}]  }
   0x1   :  { %9 = vsyncpa [#allocation4], 0  ;;  %s16_s14 = sshll.u32 %s184_s1, 4  ;;  %s147_s15 = smov [#allocation2]   ;;  %s17_s14 = int_to_ptr.hbm [resolvable:$true] %s16_s14 }
   0x2   :  { %s18_s16 = sshll.u32 %s147_s15, 4  ;;  %s148_s17 = smov 128   ;;  %s19_s16 = int_to_ptr.vmem [resolvable:$true] %s18_s16 }
   0x3   :  { %s149_s18 = smov 8  }
   0x4   :  { %24 = dma.hbm_to_vmem [thread:$0]  %s17_s14, 2048, %s19_s16, [#allocation3], %s148_s17, %s148_s17, %s149_s18  }
   0x5   :  { %143 = dma.done.wait [#allocation3], 2048  }
   0x6   :  { %144 = vsyncadd [#allocation3], 4294965248  ;;  %v47_v0 = vld [vmem:[#allocation2 + $0x78] sm:$0xff]  ;;  %v46_v1 = vld [vmem:[#allocation2 + $0x70] sm:$0xff]  ;;  %s150_s22 = smov [#allocation5]   ;;  %s80_s26 = sshll.u32 %s186_s3, 4  ;;  %s81_s26 = int_to_ptr.hbm [resolvable:$true] %s80_s26 }
   0x7   :  { %52 = vmatpush.msra.mxu0 %v47_v0  ;;  %v45_v2 = vld [vmem:[#allocation2 + $0x68] sm:$0xff]  ;;  %v44_v3 = vld [vmem:[#allocation2 + $0x60] sm:$0xff]  ;;  %v43_v4 = vld [vmem:[#allocation2 + $0x58] sm:$0xff]  ;;  %s78_s23 = sshll.u32 %s150_s22, 4  ;;  %s79_s23 = int_to_ptr.vmem [resolvable:$true] %s78_s23 }
   0x8   :  { %v42_v5 = vld [vmem:[#allocation2 + $0x50] sm:$0xff]  ;;  %v41_v6 = vld [vmem:[#allocation2 + $0x48] sm:$0xff]  ;;  %v40_v7 = vld [vmem:[#allocation2 + $0x40] sm:$0xff] }
   0x9   :  { %53 = vmatpush.msra.mxu0 %v46_v1  ;;  %v39_v8 = vld [vmem:[#allocation2 + $0x38] sm:$0xff]  ;;  %v38_v9 = vld [vmem:[#allocation2 + $0x30] sm:$0xff]  ;;  %v37_v10 = vld [vmem:[#allocation2 + $0x28] sm:$0xff] }
   0xa   :  { %v36_v11 = vld [vmem:[#allocation2 + $0x20] sm:$0xff]  ;;  %v35_v12 = vld [vmem:[#allocation2 + $0x18] sm:$0xff]  ;;  %v34_v13 = vld [vmem:[#allocation2 + $0x10] sm:$0xff] }
   0xb   :  { %54 = vmatpush.msra.mxu0 %v45_v2  ;;  %v33_v14 = vld [vmem:[#allocation2 + $0x8] sm:$0xff]  ;;  %v32_v15 = vld [vmem:[#allocation2] sm:$0xff] }
   0xc   :  { %v31_v16 = vld [vmem:[%s183_s0] sm:$0xff] }
   0xd   :  { %55 = vmatpush.msra.mxu0 %v44_v3  ;;  %v94_v17 = vld [vmem:[%s185_s2] ss:$0 sm:$0xff] }
   0xf   :  { %56 = vmatpush.msra.mxu0 %v43_v4 }
  0x11   :  { %57 = vmatpush.msra.mxu0 %v42_v5 }
  0x13   :  { %58 = vmatpush.msra.mxu0 %v41_v6 }
  0x15   :  { %59 = vmatpush.msra.mxu0 %v40_v7 }
  0x17   :  { %60 = vmatpush.msra.mxu0 %v39_v8 }
  0x19   :  { %61 = vmatpush.msra.mxu0 %v38_v9 }
  0x1b   :  { %62 = vmatpush.msra.mxu0 %v37_v10 }
  0x1d   :  { %63 = vmatpush.msra.mxu0 %v36_v11 }
  0x1f   :  { %64 = vmatpush.msra.mxu0 %v35_v12 }
  0x21   :  { %65 = vmatpush.msra.mxu0 %v34_v13 }
  0x23   :  { %66 = vmatpush.msra.mxu0 %v33_v14 }
  0x25   :  { %67 = vmatpush.msra.mxu0 %v32_v15 }
  0x26   :  { %68 = vmatmul.f32.vlgmr.msra.gmra.mxu0 %v31_v16 }
  0xa3   :  { %v69_v18 = vpop.f32.mrf.mxu0 }
  0xa4   :  { %v70_v19 = vadd.f32 %v94_v17, %v69_v18 }
  0xa6   :  { %72 = vst [vmem:[#allocation5] sm:$0xff] %v70_v19 }
  0xa7   :  { %83 = dma.vmem_to_hbm [thread:$0]  %s79_s23, 128, %s81_s26, [#allocation4]  }
  0xa8   :  { %145 = dma.done.wait [#allocation4], 128  }
  0xa9   :  { %146 = vsyncadd [#allocation4], 4294967168 }
  0xaa   :  { %88 = vsyncpa [#allocation3], 1 }
  0xab   :  { %89 = vsyncpa [#allocation4], 1 }

</bundles_post_ra>
